<compile_context>
chip_gen: v7x
topology: tpu7x:2x2x1
jax: 0.10.0
libtpu: 0.0.40
codegen_flags: <defaults>
</compile_context>

<pallas_src>
import functools

import jax
import jax.numpy as jnp
from jax.experimental import pallas as pl
from jax.experimental.pallas import tpu as pltpu


def _round_up(v, m):
    return ((v + m - 1) // m) * m


def _pick_tile(dim, desired, align):
    """Largest multiple of `align` that divides `dim` and is <= desired.

    `dim` is already a multiple of `align`, so `align` itself always works.
    """
    t = max(align, min((desired // align) * align, dim))
    while dim % t:
        t -= align
    return t


# --------------------------------------------------------------------------
# Kernels
# --------------------------------------------------------------------------
def _logistic_kernel_single_k(x_ref, w_ref, b_ref, o_ref):
    # Whole K fits in one tile: no scratch, no accumulation passes.
    acc = jnp.dot(x_ref[...], w_ref[...], preferred_element_type=jnp.float32)
    o_ref[...] = jax.nn.sigmoid(acc + b_ref[...]).astype(o_ref.dtype)


def _logistic_kernel_multi_k(x_ref, w_ref, b_ref, o_ref, acc_ref):
    k = pl.program_id(2)
    part = jnp.dot(x_ref[...], w_ref[...], preferred_element_type=jnp.float32)

    @pl.when(k == 0)
    def _():
        acc_ref[...] = part          # overwrite: no zero-fill pass needed

    @pl.when(k > 0)
    def _():
        acc_ref[...] += part

    @pl.when(k == pl.num_programs(2) - 1)
    def _():
        o_ref[...] = jax.nn.sigmoid(acc_ref[...] + b_ref[...]).astype(o_ref.dtype)


# --------------------------------------------------------------------------
# Parameter prep (hoistable: depends only on layout alignment, not tiles)
# --------------------------------------------------------------------------
def prepare_params(weight, bias):
    """weight (out, in) f32, bias (out,) -> bf16 (K_pad, N_pad) W, f32 (1, N_pad) b."""
    out_features, in_features = weight.shape
    k_pad = _round_up(in_features, 128)     # K: lane dim of x / sublane dim of W
    n_pad = _round_up(out_features, 128)    # N: lane dim of W and of the output

    # Cast to bf16 *before* transpose/pad -> half the wrapper HBM traffic on W.
    w_p = jnp.pad(weight.astype(jnp.bfloat16).T,
                  ((0, k_pad - in_features), (0, n_pad - out_features)))
    b_p = jnp.pad(bias.astype(jnp.float32),
                  (0, n_pad - out_features)).reshape(1, n_pad)
    return w_p, b_p


# --------------------------------------------------------------------------
# Forward
# --------------------------------------------------------------------------
@functools.partial(jax.jit, static_argnames=("tb", "tn", "tk"))
def logistic_forward(x, weight, bias, *, tb=512, tn=512, tk=512):
    """y = sigmoid(x @ weight.T + bias); weight (out, in), bias (out,)."""
    batch, in_features = x.shape
    out_features = weight.shape[0]
    out_dtype = x.dtype

    # ---- layout plumbing (all wrapper-side, minimal padding) -------------
    b_pad = _round_up(batch, 16)            # bf16 sublane packing for x rows
    w_p, b_p = prepare_params(weight, bias)  # hoistable for static weights
    k_pad, n_pad = w_p.shape

    x_p = jnp.pad(x.astype(jnp.bfloat16),   # cast first, then pad (bf16 bytes)
                  ((0, b_pad - batch), (0, k_pad - in_features)))

    # Tiles: aligned divisors of the (minimally) padded dims.
    tb = _pick_tile(b_pad, tb, 16)
    tk = _pick_tile(k_pad, tk, 128)
    tn = _pick_tile(n_pad, tn, 128)

    b_tiles, n_tiles, k_tiles = b_pad // tb, n_pad // tn, k_pad // tk

    # VMEM footprint (double-buffered ins/outs + f32 acc); raise the scoped
    # limit only if needed, capped well under v7x's 64 MiB.
    out_itemsize = jnp.dtype(out_dtype).itemsize
    vmem_bytes = (2 * (tb * tk * 2 + tk * tn * 2 + tb * tn * out_itemsize)
                  + tb * tn * 4 + 2 * tn * 4)
    vmem_limit = None
    if vmem_bytes > 24 * 1024 * 1024:
        vmem_limit = min(int(vmem_bytes * 3 // 2), 48 * 1024 * 1024)

    if k_tiles == 1:
        # ---- fast path: whole reduction in one tile, no scratch ----------
        grid = (n_tiles, b_tiles)            # out first -> megacore splits W
        out = pl.pallas_call(
            _logistic_kernel_single_k,
            out_shape=jax.ShapeDtypeStruct((b_pad, n_pad), out_dtype),
            grid_spec=pltpu.PrefetchScalarGridSpec(
                num_scalar_prefetch=0,
                grid=grid,
                in_specs=[
                    pl.BlockSpec((tb, tk), lambda j, i: (i, 0)),   # x
                    pl.BlockSpec((tk, tn), lambda j, i: (0, j)),   # W
                    pl.BlockSpec((1, tn), lambda j, i: (0, j)),    # bias
                ],
                out_specs=pl.BlockSpec((tb, tn), lambda j, i: (i, j)),
            ),
            compiler_params=pltpu.CompilerParams(
                dimension_semantics=("parallel", "parallel"),
                vmem_limit_bytes=vmem_limit,
            ),
        )(x_p, w_p, b_p)
    else:
        # ---- general path: K innermost, f32 accumulator in VMEM ----------
        grid = (n_tiles, b_tiles, k_tiles)
        out = pl.pallas_call(
            _logistic_kernel_multi_k,
            out_shape=jax.ShapeDtypeStruct((b_pad, n_pad), out_dtype),
            grid_spec=pltpu.PrefetchScalarGridSpec(
                num_scalar_prefetch=0,
                grid=grid,
                in_specs=[
                    pl.BlockSpec((tb, tk), lambda j, i, k: (i, k)),   # x
                    pl.BlockSpec((tk, tn), lambda j, i, k: (k, j)),   # W
                    pl.BlockSpec((1, tn), lambda j, i, k: (0, j)),    # bias
                ],
                out_specs=pl.BlockSpec((tb, tn), lambda j, i, k: (i, j)),
                scratch_shapes=[pltpu.VMEM((tb, tn), jnp.float32)],
            ),
            compiler_params=pltpu.CompilerParams(
                dimension_semantics=("parallel", "parallel", "arbitrary"),
                vmem_limit_bytes=vmem_limit,
            ),
        )(x_p, w_p, b_p)

    return out[:batch, :out_features]


# --------------------------------------------------------------------------
# Demo / self-check
# --------------------------------------------------------------------------
def _reference(x, weight, bias):
    # Same bf16-operand / f32-accumulate math as the kernel.
    # TODO(synk): bf16 MXU operands diverge slightly from a pure-f32 PyTorch
    # Linear; acceptable for logistic-regression-style heads.
    xf = x.astype(jnp.bfloat16).astype(jnp.float32)
    wf = weight.astype(jnp.bfloat16).astype(jnp.float32)
    return jax.nn.sigmoid(jnp.dot(xf, wf.T, preferred_element_type=jnp.float32)
                          + bias.astype(jnp.float32))


if __name__ == "__main__":
    key = jax.random.PRNGKey(0)

    # --- small demo shapes implied by the module (single-K fast path) -----
    batch, input_size, output_size = 8, 32, 8
    kx, kw, kb = jax.random.split(key, 3)
    bound = 1.0 / (input_size ** 0.5)
    x = jax.random.normal(kx, (batch, input_size), dtype=jnp.float32)
    weight = jax.random.uniform(kw, (output_size, input_size),
                                minval=-bound, maxval=bound, dtype=jnp.float32)
    bias = jax.random.uniform(kb, (output_size,),
                              minval=-bound, maxval=bound, dtype=jnp.float32)

    y = logistic_forward(x, weight, bias)
    jax.block_until_ready(y)
    y_ref = _reference(x, weight, bias)
    assert y.shape == (batch, output_size)
    assert jnp.allclose(y, y_ref, atol=1e-2, rtol=1e-2), \
        float(jnp.max(jnp.abs(y - y_ref)))

    # --- exercise the multi-K accumulator path too -------------------------
    batch2, in2, out2 = 32, 1024, 192
    k2 = jax.random.PRNGKey(1)
    kx2, kw2, kb2 = jax.random.split(k2, 3)
    bound2 = 1.0 / (in2 ** 0.5)
    x2 = jax.random.normal(kx2, (batch2, in2), dtype=jnp.float32)
    w2 = jax.random.uniform(kw2, (out2, in2), minval=-bound2, maxval=bound2,
                            dtype=jnp.float32)
    b2 = jax.random.uniform(kb2, (out2,), minval=-bound2, maxval=bound2,
                            dtype=jnp.float32)

    y2 = logistic_forward(x2, w2, b2, tk=256)   # 1024/256 -> 4 K tiles
    jax.block_until_ready(y2)
    y2_ref = _reference(x2, w2, b2)
    assert y2.shape == (batch2, out2)
    assert jnp.allclose(y2, y2_ref, atol=1e-2, rtol=1e-2), \
        float(jnp.max(jnp.abs(y2 - y2_ref)))

    print("KERNEL_OK")
</pallas_src>

<mosaic_0001>
module attributes {stable_mosaic.version = 11 : i64} {
  func.func @_logistic_kernel_single_k(%arg0: i32, %arg1: i32, %arg2: memref<16x128xbf16, #tpu.memory_space<vmem>>, %arg3: memref<128x128xbf16, #tpu.memory_space<vmem>>, %arg4: memref<1x128xf32, #tpu.memory_space<vmem>>, %arg5: memref<16x128xf32, #tpu.memory_space<vmem>>) attributes {dimension_semantics = [#tpu.dimension_semantics<parallel>, #tpu.dimension_semantics<parallel>], iteration_bounds = array<i64: 1, 1>, scalar_prefetch = 0 : i64, scratch_operands = 0 : i64, tpu.core_type = #tpu.core_type<tc>, window_params = [{transform_indices = @transform_0, window_bounds = array<i64: 16, 128>}, {transform_indices = @transform_1, window_bounds = array<i64: 128, 128>}, {transform_indices = @transform_2, window_bounds = array<i64: 1, 128>}, {transform_indices = @transform_3, window_bounds = array<i64: 16, 128>}]} {
    %c0 = arith.constant 0 : index
    %c0_0 = arith.constant 0 : index
    %0 = vector.load %arg2[%c0, %c0_0] : memref<16x128xbf16, #tpu.memory_space<vmem>>, vector<16x128xbf16>
    %c0_1 = arith.constant 0 : index
    %c0_2 = arith.constant 0 : index
    %1 = vector.load %arg3[%c0_1, %c0_2] : memref<128x128xbf16, #tpu.memory_space<vmem>>, vector<128x128xbf16>
    %cst = arith.constant dense<0.000000e+00> : vector<16x128xf32>
    %2 = tpu.matmul %0, %1, %cst {dimension_numbers = #tpu.dot_dimension_numbers<[1], [0], [0], [1], [0, 0, 1, 1], [], []>} : vector<16x128xbf16>, vector<128x128xbf16>, vector<16x128xf32> -> vector<16x128xf32>
    %c0_3 = arith.constant 0 : index
    %c0_4 = arith.constant 0 : index
    %3 = vector.load %arg4[%c0_3, %c0_4] : memref<1x128xf32, #tpu.memory_space<vmem>>, vector<1x128xf32>
    %4 = vector.broadcast %3 : vector<1x128xf32> to vector<16x128xf32>
    %5 = arith.addf %2, %4 : vector<16x128xf32>
    %6 = arith.negf %5 : vector<16x128xf32>
    %7 = math.exp %6 : vector<16x128xf32>
    %cst_5 = arith.constant 1.000000e+00 : f32
    %8 = vector.broadcast %cst_5 : f32 to vector<16x128xf32>
    %9 = arith.addf %8, %7 : vector<16x128xf32>
    %10 = arith.divf %8, %9 : vector<16x128xf32>
    %c0_6 = arith.constant 0 : index
    %c0_7 = arith.constant 0 : index
    %11 = vector.load %arg5[%c0_6, %c0_7] : memref<16x128xf32, #tpu.memory_space<vmem>>, vector<16x128xf32>
    tpu.vector_store %arg5[%c0_6, %c0_7], %10 {strides = array<i32>} : memref<16x128xf32, #tpu.memory_space<vmem>>, vector<16x128xf32>,
    return
  }
  func.func @transform_0(%arg0: i32, %arg1: i32) -> (i32, i32) {
    %c0_i32 = arith.constant 0 : i32
    %c0_i32_0 = arith.constant 0 : i32
    return %arg1, %c0_i32 : i32, i32
  }
  func.func @transform_1(%arg0: i32, %arg1: i32) -> (i32, i32) {
    %c0_i32 = arith.constant 0 : i32
    %c0_i32_0 = arith.constant 0 : i32
    return %c0_i32, %arg0 : i32, i32
  }
  func.func @transform_2(%arg0: i32, %arg1: i32) -> (i32, i32) {
    %c0_i32 = arith.constant 0 : i32
    %c0_i32_0 = arith.constant 0 : i32
    return %c0_i32, %arg0 : i32, i32
  }
  func.func @transform_3(%arg0: i32, %arg1: i32) -> (i32, i32) {
    %c0_i32 = arith.constant 0 : i32
    return %arg1, %arg0 : i32, i32
  }
}

</mosaic_0001>

<bundles_post_ra>
// kernel: logistic_forward.1
= control target key start
LH: loop header
LB: loop body
LE: loop exit
PB: predicated region body
PF: predicated region fallthrough
CT: control target
= control target key end

     0   :  { %v213_v0 = vmov 0.0   ;;  %vm214_vm0 = vmmov 0   ;;  %s271_s1 = inlined_call_operand.vmem [shape: bf16[128,128], index: 1, kind: input, shape index: {}]   ;;  %s272_s0 = inlined_call_operand.vmem [shape: bf16[16,128], index: 0, kind: input, shape index: {}]   ;;  %s273_s2 = inlined_call_operand.vmem [shape: f32[1,128], index: 2, kind: input, shape index: {}]   ;;  %s274_s3 = inlined_call_operand.vmem [shape: f32[16,128], index: 3, kind: output, shape index: {}]  }
   0x1   :  { %174 = vmatprep.subr.bf16.mxu0 %v213_v0  ;;  %v196_v1 = vld [vmem:[%s271_s1] sm:$0xff]   ;;  %190 = vmatprep.mubr.msk.bf16.mxu0 %vm214_vm0, %v213_v0  ;;  %v197_v2 = vld [vmem:[%s271_s1 + $0x8] sm:$0xff]   ;;  %v198_v3 = vld [vmem:[%s271_s1 + $0x10] sm:$0xff]  }
   0x2   :  { %175 = vmatpush3.bf16.msra.mxu0 %v196_v1  ;;  %v199_v4 = vld [vmem:[%s271_s1 + $0x18] sm:$0xff]   ;;  %v200_v5 = vld [vmem:[%s271_s1 + $0x20] sm:$0xff]   ;;  %v201_v6 = vld [vmem:[%s271_s1 + $0x28] sm:$0xff]  }
   0x3   :  { %176 = vmatprep.subr.bf16.mxu0 %v213_v0  ;;  %v202_v7 = vld [vmem:[%s271_s1 + $0x30] sm:$0xff]   ;;  %v203_v8 = vld [vmem:[%s271_s1 + $0x38] sm:$0xff]   ;;  %v204_v9 = vld [vmem:[%s272_s0] sm:$0xff]  }
   0x4   :  { %v153_v10 = vld [vmem:[%s273_s2] ss:$0 sm:$0xff] }
   0x6   :  { %177 = vmatpush3.bf16.msra.mxu0 %v197_v2 }
   0x7   :  { %178 = vmatprep.subr.bf16.mxu0 %v213_v0 }
   0xa   :  { %179 = vmatpush3.bf16.msra.mxu0 %v198_v3 }
   0xb   :  { %180 = vmatprep.subr.bf16.mxu0 %v213_v0 }
   0xe   :  { %181 = vmatpush3.bf16.msra.mxu0 %v199_v4 }
   0xf   :  { %182 = vmatprep.subr.bf16.mxu0 %v213_v0 }
  0x12   :  { %183 = vmatpush3.bf16.msra.mxu0 %v200_v5 }
  0x13   :  { %184 = vmatprep.subr.bf16.mxu0 %v213_v0 }
  0x16   :  { %185 = vmatpush3.bf16.msra.mxu0 %v201_v6 }
  0x17   :  { %186 = vmatprep.subr.bf16.mxu0 %v213_v0 }
  0x1a   :  { %187 = vmatpush3.bf16.msra.mxu0 %v202_v7 }
  0x1b   :  { %188 = vmatprep.subr.bf16.mxu0 %v213_v0 }
  0x1e   :  { %189 = vmatpush3.bf16.msra.mxu0 %v203_v8 }
  0x21   :  { %191 = vmatmul.mubr.bf16.vlgmr.msra.gmra.mrb[0].mxu0 %v204_v9 }
  0xf4   :  { %v128_v11 = vpop.f32.mrb[0].mxu0 }
  0xf5   :  { %v129_v12 = vadd.f32 %v153_v10, %v128_v11  ;;  %v192_v13 = vpop.f32.mrb[1].mxu0 }
  0xf6   :  { %v131_v14 = vpop.f32.mrb[2].mxu0 }
  0xf7   :  { %v163_v15 = vmul.f32 -1.442695, %v129_v12  ;;  %v132_v16 = vadd.f32 %v153_v10, %v131_v14  ;;  %v193_v17 = vpop.f32.mrb[3].mxu0 }
  0xf9   :  { %205 = vpow2.f32 %v163_v15  ;;  %v164_v18 = vmul.f32 -1.442695, %v132_v16 }
  0xfb   :  { %207 = vpow2.f32 %v164_v18 }
 0x103   :  { %v206_v19 = vpop.eup %205 }
 0x104   :  { %v141_v20 = vadd.f32 1.0, %v206_v19 }
 0x105   :  { %v208_v21 = vpop.eup %207 }
 0x106   :  { %209 = vrcp.f32 %v141_v20  ;;  %v142_v22 = vadd.f32 1.0, %v208_v21 }
 0x108   :  { %211 = vrcp.f32 %v142_v22 }
 0x110   :  { %v210_v23 = vpop.eup %209 }
 0x111   :  { %147 = vst [vmem:[%s274_s3] sm:$0xff] %v210_v23 }
 0x112   :  { %v212_v24 = vpop.eup %211 }
 0x113   :  { %148 = vst [vmem:[%s274_s3 + $0x8] sm:$0xff] %v212_v24 }

</bundles_post_ra>
